<compile_context>
chip_gen: v7x
topology: tpu7x:2x2x1
jax: 0.10.0
libtpu: 0.0.40
codegen_flags: <defaults>
</compile_context>

<pallas_src>
import numpy as np
import jax
import jax.numpy as jnp
from jax.experimental import pallas as pl
from jax.experimental.pallas import tpu as pltpu

FLAG_FEATS = (("gaze", 3), ("au", 18), ("head", 4), ("pose", 21))
HIDDEN = 16                                   # conf[flag][f'{flag}_module']['input_size']
F_TOT = sum(f for _, f in FLAG_FEATS)         # 46  (concatenated raw features)
D = HIDDEN * len(FLAG_FEATS)                  # 64  (non_verbal_module input size)
OUT = 32                                      # conf['linear']['output_size']
EPS = 1e-5
PACK = 4                                      # logical rows packed per lane-dense row
LANES = PACK * OUT                            # 128
FP = PACK * F_TOT                             # 184 packed input width
DP = PACK * D                                 # 256 packed hidden width
TR_CAP = 2048                                 # max logical rows per grid step


def _seg_mean_matrix(n, seg):
    idx = np.arange(n)
    return (((idx[:, None] // seg) == (idx[None, :] // seg)).astype(np.float32) / seg)


# Constant matrices, built once at import time (become jit constants; zero per-call work).
_M16 = _seg_mean_matrix(DP, HIDDEN)           # (256,256) per-flag LN 16-wide segment mean
_M32 = _seg_mean_matrix(LANES, OUT)           # (128,128) final LN 32-wide segment mean
_EXP = np.zeros((2 * PACK, 2 * LANES), np.float32)   # (8,256) BN scale/shift lane expander
for _j in range(PACK):
    _EXP[_j, _j * OUT:(_j + 1) * OUT] = 1.0                               # scale -> [0,128)
    _EXP[PACK + _j, LANES + _j * OUT:LANES + (_j + 1) * OUT] = 1.0        # shift -> [128,256)


# ----------------------------------------------------------------------------- kernel
def nonverbal_kernel(x1_ref, x2_ref, wf_ref, m1_ref, cd_ref, bn_ref, e_ref,
                     w2_ref, co_ref, m2_ref, out_ref):
    # Everything runs on the consecutive-row lane-packed form:
    #   packed row r holds logical rows 4r..4r+3 side by side along lanes.
    f32 = jnp.float32

    x = x1_ref[...] + x2_ref[...]                                          # (TRp, 184)

    # all per-flag Linears: packed x @ (4x block-diagonal fused per-flag W)
    h = jnp.dot(x, wf_ref[...], preferred_element_type=f32) + cd_ref[0:1, :]   # (TRp, 256)

    # per-flag LayerNorm (16-wide segments), two-pass via segment-mean matmuls
    mu = jnp.dot(h, m1_ref[...], preferred_element_type=f32)
    d = h - mu
    var = jnp.dot(d * d, m1_ref[...], preferred_element_type=f32)
    z = d * jax.lax.rsqrt(var + EPS) * cd_ref[1:2, :] + cd_ref[2:3, :]

    # final Linear (packed block-diag) with BatchNorm1d(t_dim) eval affine folded in:
    #   (s*z + c) @ W2 + b2 == s*(z@W2) + c*colsum(W2) + b2
    y0 = jnp.dot(z, w2_ref[...], preferred_element_type=f32)               # (TRp, 128)
    sc = jnp.dot(bn_ref[...], e_ref[:, 0:LANES], preferred_element_type=f32)        # s per lane
    sh = jnp.dot(bn_ref[...], e_ref[:, LANES:2 * LANES], preferred_element_type=f32)  # c per lane
    y = sc * y0 + (sh * co_ref[3:4, :] + co_ref[0:1, :])

    # final LayerNorm over each 32-lane segment, two-pass via segment-mean matmuls
    mu2 = jnp.dot(y, m2_ref[...], preferred_element_type=f32)
    d2 = y - mu2
    var2 = jnp.dot(d2 * d2, m2_ref[...], preferred_element_type=f32)
    out_ref[...] = d2 * jax.lax.rsqrt(var2 + EPS) * co_ref[1:2, :] + co_ref[2:3, :]


# ---------------------------------------------------------------------------- wrapper
def _choose_tiling(rows):
    units = -(-rows // 32)                         # 32-logical-row units
    nblk = max(1, -(-(units * 32) // TR_CAP))      # enough blocks to cap TR at TR_CAP
    if units >= 2:
        nblk = max(nblk, 2)                        # >=2 blocks so v7x uses both TCs
    if nblk > 1 and nblk % 2:
        nblk += 1                                  # even block count -> balanced split
    units_padded = -(-units // nblk) * nblk
    TR = (units_padded // nblk) * 32               # logical rows per block (mult of 32)
    return TR, nblk, units_padded * 32


def _block_diag4(w):
    r, c = w.shape
    m = jnp.zeros((PACK * r, PACK * c), w.dtype)
    for j in range(PACK):
        m = m.at[j * r:(j + 1) * r, j * c:(j + 1) * c].set(w)
    return m


@jax.jit
def nonverbal_condition(x1, x2, params):
    B, T, _ = x1.shape
    rows = B * T
    TR, nblk, rows_padded = _choose_tiling(rows)
    pad_r = rows_padded - rows
    TRp = TR // PACK                               # packed rows per block
    rowsP = rows_padded // PACK

    x1f = x1.reshape(rows, F_TOT)
    x2f = x2.reshape(rows, F_TOT)

    # BatchNorm1d(t_dim) eval-mode affine -> per-logical-row scalar (scale, shift)
    s = params["bn_g"] * jax.lax.rsqrt(params["bn_v"] + EPS)               # (T, 1)
    c = params["bn_b"] - params["bn_m"] * s                                # (T, 1)
    s_rows = jnp.tile(s[:, 0], (B,))                                       # (rows,)
    c_rows = jnp.tile(c[:, 0], (B,))

    if pad_r:  # only when rows isn't already aligned (skipped -> no full-array copy)
        x1f = jnp.pad(x1f, ((0, pad_r), (0, 0)))
        x2f = jnp.pad(x2f, ((0, pad_r), (0, 0)))
        s_rows = jnp.pad(s_rows, (0, pad_r))
        c_rows = jnp.pad(c_rows, (0, pad_r))

    # consecutive-row lane packing: these reshapes are free (contiguous views)
    x1p = x1f.reshape(rowsP, FP)
    x2p = x2f.reshape(rowsP, FP)
    bnp = jnp.concatenate([s_rows.reshape(rowsP, PACK),
                           c_rows.reshape(rowsP, PACK)], axis=1)           # (rowsP, 8)

    # packed (4x block-diagonal) weights + packed broadcast constants (tiny, per call)
    wfp = _block_diag4(params["w_big"])                                    # (184, 256)
    w2p = _block_diag4(params["w2"])                                       # (256, 128)
    cdp = jnp.tile(jnp.concatenate(
        [params["b_big"], params["lnf_g"], params["lnf_b"]], axis=0), (1, PACK))   # (3, 256)
    co = jnp.tile(jnp.concatenate(
        [params["b2"], params["ln2_g"], params["ln2_b"],
         jnp.sum(params["w2"], axis=0, keepdims=True)], axis=0), (1, PACK))        # (4, 128)

    rowmap = lambda i: (i, 0)
    constmap = lambda i: (0, 0)

    out_wide = pl.pallas_call(
        nonverbal_kernel,
        out_shape=jax.ShapeDtypeStruct((rowsP, LANES), jnp.float32),
        grid_spec=pltpu.PrefetchScalarGridSpec(
            num_scalar_prefetch=0,
            grid=(nblk,),
            in_specs=[
                pl.BlockSpec((TRp, FP), rowmap),                 # packed x user1
                pl.BlockSpec((TRp, FP), rowmap),                 # packed x user2
                pl.BlockSpec((FP, DP), constmap),                # 4x block-diag per-flag W
                pl.BlockSpec((DP, DP), constmap),                # per-flag LN segment-mean M
                pl.BlockSpec((3, DP), constmap),                 # [b_big; lnf_g; lnf_b] tiled
                pl.BlockSpec((TRp, 2 * PACK), rowmap),           # BN per-row [s0..s3, c0..c3]
                pl.BlockSpec((2 * PACK, 2 * LANES), constmap),   # BN lane expander
                pl.BlockSpec((DP, LANES), constmap),             # 4x block-diag final W
                pl.BlockSpec((4, LANES), constmap),              # [b2; ln2_g; ln2_b; colsum]
                pl.BlockSpec((LANES, LANES), constmap),          # final LN segment-mean M
            ],
            out_specs=pl.BlockSpec((TRp, LANES), rowmap),        # lane-dense packed output
        ),
        compiler_params=pltpu.CompilerParams(
            dimension_semantics=("parallel",)),
    )(x1p, x2p, wfp, jnp.asarray(_M16), cdp, bnp, jnp.asarray(_EXP), w2p, co,
      jnp.asarray(_M32))

    # consecutive-row packing -> the unpack is a single free reshape
    out = out_wide.reshape(rows_padded, OUT)
    if pad_r:
        out = out[:rows]
    return out.reshape(B, T, OUT)


# -------------------------------------------------------------------- params / glue
def init_params(key, T):
    keys = jax.random.split(key, 24)
    w_big = jnp.zeros((F_TOT, D), jnp.float32)
    b_big = jnp.zeros((1, D), jnp.float32)
    lnf_g = jnp.zeros((1, D), jnp.float32)
    lnf_b = jnp.zeros((1, D), jnp.float32)
    row = 0
    for i, (_, f) in enumerate(FLAG_FEATS):
        kw, kb, kg, kbe = jax.random.split(keys[i], 4)
        w = 0.2 * jax.random.normal(kw, (f, HIDDEN), jnp.float32)
        b = 0.1 * jax.random.normal(kb, (HIDDEN,), jnp.float32)
        g = 1.0 + 0.1 * jax.random.normal(kg, (HIDDEN,), jnp.float32)
        be = 0.05 * jax.random.normal(kbe, (HIDDEN,), jnp.float32)
        lo, hi = i * HIDDEN, (i + 1) * HIDDEN
        w_big = w_big.at[row:row + f, lo:hi].set(w)      # block-diagonal == per-flag Linear
        b_big = b_big.at[0, lo:hi].set(b)
        lnf_g = lnf_g.at[0, lo:hi].set(g)
        lnf_b = lnf_b.at[0, lo:hi].set(be)
        row += f

    params = dict(
        w_big=w_big, b_big=b_big, lnf_g=lnf_g, lnf_b=lnf_b,
        bn_g=(1.0 + 0.1 * jax.random.normal(keys[10], (T,))).reshape(T, 1).astype(jnp.float32),
        bn_b=(0.05 * jax.random.normal(keys[11], (T,))).reshape(T, 1).astype(jnp.float32),
        bn_m=(0.1 * jax.random.normal(keys[12], (T,))).reshape(T, 1).astype(jnp.float32),
        bn_v=(1.0 + 0.3 * jax.random.uniform(keys[13], (T,))).reshape(T, 1).astype(jnp.float32),
        w2=0.15 * jax.random.normal(keys[14], (D, OUT), jnp.float32),
        b2=0.1 * jax.random.normal(keys[15], (1, OUT), jnp.float32),
        ln2_g=(1.0 + 0.1 * jax.random.normal(keys[16], (1, OUT))).astype(jnp.float32),
        ln2_b=(0.05 * jax.random.normal(keys[17], (1, OUT))).astype(jnp.float32),
    )
    return params


# Pure-JAX reference mirroring the PyTorch module (per-flag path, not fused).
def reference(per_flag_inputs, params):
    def ln(x, g, b):
        mu = jnp.mean(x, axis=-1, keepdims=True)
        var = jnp.mean((x - mu) ** 2, axis=-1, keepdims=True)
        return (x - mu) / jnp.sqrt(var + EPS) * g + b

    conditions = []
    row = 0
    for i, (name, f) in enumerate(FLAG_FEATS):
        lo, hi = i * HIDDEN, (i + 1) * HIDDEN
        w = params["w_big"][row:row + f, lo:hi]
        b = params["b_big"][0, lo:hi]
        u1, u2 = per_flag_inputs[f"{name}_user1"], per_flag_inputs[f"{name}_user2"]
        h = jnp.einsum("btf,fh->bth", u1 + u2, w,
                       precision=jax.lax.Precision.HIGHEST) + b
        conditions.append(ln(h, params["lnf_g"][0, lo:hi], params["lnf_b"][0, lo:hi]))
        row += f
    z = jnp.concatenate(conditions, axis=2)
    scale = (params["bn_g"][:, 0] / jnp.sqrt(params["bn_v"][:, 0] + EPS))[None, :, None]
    z = (z - params["bn_m"][:, 0][None, :, None]) * scale + params["bn_b"][:, 0][None, :, None]
    y = jnp.einsum("btd,do->bto", z, params["w2"],
                   precision=jax.lax.Precision.HIGHEST) + params["b2"][0]
    return ln(y, params["ln2_g"][0], params["ln2_b"][0])


if __name__ == "__main__":
    B, T = 2, 8
    key = jax.random.PRNGKey(0)
    k_par, k_in = jax.random.split(key)
    params = init_params(k_par, T)

    # per-flag, per-user inputs exactly as the PyTorch forward(**kwargs) expects
    per_flag = {}
    kin = jax.random.split(k_in, 2 * len(FLAG_FEATS))
    for i, (name, f) in enumerate(FLAG_FEATS):
        per_flag[f"{name}_user1"] = jax.random.normal(kin[2 * i], (B, T, f), jnp.float32)
        per_flag[f"{name}_user2"] = jax.random.normal(kin[2 * i + 1], (B, T, f), jnp.float32)

    # glue: concatenate raw features along the last axis for the fused kernel
    x1 = jnp.concatenate([per_flag[f"{n}_user1"] for n, _ in FLAG_FEATS], axis=-1)
    x2 = jnp.concatenate([per_flag[f"{n}_user2"] for n, _ in FLAG_FEATS], axis=-1)

    out = nonverbal_condition(x1, x2, params)
    out = jax.block_until_ready(out)

    ref = jax.block_until_ready(reference(per_flag, params))
    assert out.shape == (B, T, OUT) and out.dtype == jnp.float32
    assert jnp.allclose(out, ref, rtol=1e-3, atol=1e-3), float(jnp.max(jnp.abs(out - ref)))

    print("KERNEL_OK")
</pallas_src>

<mosaic_0001>
module attributes {stable_mosaic.version = 11 : i64} {
  func.func @nonverbal_kernel(%arg0: i32, %arg1: memref<8x184xf32, #tpu.memory_space<vmem>>, %arg2: memref<8x184xf32, #tpu.memory_space<vmem>>, %arg3: memref<184x256xf32, #tpu.memory_space<vmem>>, %arg4: memref<256x256xf32, #tpu.memory_space<vmem>>, %arg5: memref<3x256xf32, #tpu.memory_space<vmem>>, %arg6: memref<8x8xf32, #tpu.memory_space<vmem>>, %arg7: memref<8x256xf32, #tpu.memory_space<vmem>>, %arg8: memref<256x128xf32, #tpu.memory_space<vmem>>, %arg9: memref<4x128xf32, #tpu.memory_space<vmem>>, %arg10: memref<128x128xf32, #tpu.memory_space<vmem>>, %arg11: memref<8x128xf32, #tpu.memory_space<vmem>>) attributes {dimension_semantics = [#tpu.dimension_semantics<parallel>], iteration_bounds = array<i64: 1>, scalar_prefetch = 0 : i64, scratch_operands = 0 : i64, tpu.core_type = #tpu.core_type<tc>, window_params = [{transform_indices = @transform_0, window_bounds = array<i64: 8, 184>}, {transform_indices = @transform_1, window_bounds = array<i64: 8, 184>}, {pipeline_mode = #tpu.pipeline_mode<synchronous>, transform_indices = @transform_2, window_bounds = array<i64: 184, 256>}, {pipeline_mode = #tpu.pipeline_mode<synchronous>, transform_indices = @transform_3, window_bounds = array<i64: 256, 256>}, {pipeline_mode = #tpu.pipeline_mode<synchronous>, transform_indices = @transform_4, window_bounds = array<i64: 3, 256>}, {transform_indices = @transform_5, window_bounds = array<i64: 8, 8>}, {pipeline_mode = #tpu.pipeline_mode<synchronous>, transform_indices = @transform_6, window_bounds = array<i64: 8, 256>}, {pipeline_mode = #tpu.pipeline_mode<synchronous>, transform_indices = @transform_7, window_bounds = array<i64: 256, 128>}, {pipeline_mode = #tpu.pipeline_mode<synchronous>, transform_indices = @transform_8, window_bounds = array<i64: 4, 128>}, {pipeline_mode = #tpu.pipeline_mode<synchronous>, transform_indices = @transform_9, window_bounds = array<i64: 128, 128>}, {transform_indices = @transform_10, window_bounds = array<i64: 8, 128>}]} {
    %c0 = arith.constant 0 : index
    %c0_0 = arith.constant 0 : index
    %0 = vector.load %arg1[%c0, %c0_0] : memref<8x184xf32, #tpu.memory_space<vmem>>, vector<8x184xf32>
    %c0_1 = arith.constant 0 : index
    %c0_2 = arith.constant 0 : index
    %1 = vector.load %arg2[%c0_1, %c0_2] : memref<8x184xf32, #tpu.memory_space<vmem>>, vector<8x184xf32>
    %2 = arith.addf %0, %1 : vector<8x184xf32>
    %c0_3 = arith.constant 0 : index
    %c0_4 = arith.constant 0 : index
    %3 = vector.load %arg3[%c0_3, %c0_4] : memref<184x256xf32, #tpu.memory_space<vmem>>, vector<184x256xf32>
    %cst = arith.constant dense<0.000000e+00> : vector<8x256xf32>
    %4 = tpu.matmul %2, %3, %cst {dimension_numbers = #tpu.dot_dimension_numbers<[1], [0], [0], [1], [0, 0, 1, 1], [], []>} : vector<8x184xf32>, vector<184x256xf32>, vector<8x256xf32> -> vector<8x256xf32>
    %c0_5 = arith.constant 0 : index
    %c0_6 = arith.constant 0 : index
    %5 = vector.load %arg5[%c0_5, %c0_6] : memref<3x256xf32, #tpu.memory_space<vmem>>, vector<1x256xf32>
    %6 = vector.broadcast %5 : vector<1x256xf32> to vector<8x256xf32>
    %7 = arith.addf %4, %6 : vector<8x256xf32>
    %c0_7 = arith.constant 0 : index
    %c0_8 = arith.constant 0 : index
    %8 = vector.load %arg4[%c0_7, %c0_8] : memref<256x256xf32, #tpu.memory_space<vmem>>, vector<256x256xf32>
    %cst_9 = arith.constant dense<0.000000e+00> : vector<8x256xf32>
    %9 = tpu.matmul %7, %8, %cst_9 {dimension_numbers = #tpu.dot_dimension_numbers<[1], [0], [0], [1], [0, 0, 1, 1], [], []>} : vector<8x256xf32>, vector<256x256xf32>, vector<8x256xf32> -> vector<8x256xf32>
    %10 = arith.subf %7, %9 : vector<8x256xf32>
    %11 = arith.mulf %10, %10 : vector<8x256xf32>
    %c0_10 = arith.constant 0 : index
    %c0_11 = arith.constant 0 : index
    %12 = vector.load %arg4[%c0_10, %c0_11] : memref<256x256xf32, #tpu.memory_space<vmem>>, vector<256x256xf32>
    %cst_12 = arith.constant dense<0.000000e+00> : vector<8x256xf32>
    %13 = tpu.matmul %11, %12, %cst_12 {dimension_numbers = #tpu.dot_dimension_numbers<[1], [0], [0], [1], [0, 0, 1, 1], [], []>} : vector<8x256xf32>, vector<256x256xf32>, vector<8x256xf32> -> vector<8x256xf32>
    %cst_13 = arith.constant 9.99999974E-6 : f32
    %14 = vector.broadcast %cst_13 : f32 to vector<8x256xf32>
    %15 = arith.addf %13, %14 : vector<8x256xf32>
    %16 = math.rsqrt %15 : vector<8x256xf32>
    %17 = arith.mulf %10, %16 : vector<8x256xf32>
    %c1 = arith.constant 1 : index
    %c0_14 = arith.constant 0 : index
    %18 = vector.load %arg5[%c1, %c0_14] : memref<3x256xf32, #tpu.memory_space<vmem>>, vector<1x256xf32>
    %19 = vector.broadcast %18 : vector<1x256xf32> to vector<8x256xf32>
    %20 = arith.mulf %17, %19 : vector<8x256xf32>
    %c2 = arith.constant 2 : index
    %c0_15 = arith.constant 0 : index
    %21 = vector.load %arg5[%c2, %c0_15] : memref<3x256xf32, #tpu.memory_space<vmem>>, vector<1x256xf32>
    %22 = vector.broadcast %21 : vector<1x256xf32> to vector<8x256xf32>
    %23 = arith.addf %20, %22 : vector<8x256xf32>
    %c0_16 = arith.constant 0 : index
    %c0_17 = arith.constant 0 : index
    %24 = vector.load %arg8[%c0_16, %c0_17] : memref<256x128xf32, #tpu.memory_space<vmem>>, vector<256x128xf32>
    %cst_18 = arith.constant dense<0.000000e+00> : vector<8x128xf32>
    %25 = tpu.matmul %23, %24, %cst_18 {dimension_numbers = #tpu.dot_dimension_numbers<[1], [0], [0], [1], [0, 0, 1, 1], [], []>} : vector<8x256xf32>, vector<256x128xf32>, vector<8x128xf32> -> vector<8x128xf32>
    %c0_19 = arith.constant 0 : index
    %c0_20 = arith.constant 0 : index
    %26 = vector.load %arg6[%c0_19, %c0_20] : memref<8x8xf32, #tpu.memory_space<vmem>>, vector<8x8xf32>
    %c0_21 = arith.constant 0 : index
    %c0_22 = arith.constant 0 : index
    %27 = vector.load %arg7[%c0_21, %c0_22] : memref<8x256xf32, #tpu.memory_space<vmem>>, vector<8x128xf32>
    %cst_23 = arith.constant dense<0.000000e+00> : vector<8x128xf32>
    %28 = tpu.matmul %26, %27, %cst_23 {dimension_numbers = #tpu.dot_dimension_numbers<[1], [0], [0], [1], [0, 0, 1, 1], [], []>} : vector<8x8xf32>, vector<8x128xf32>, vector<8x128xf32> -> vector<8x128xf32>
    %c0_24 = arith.constant 0 : index
    %c0_25 = arith.constant 0 : index
    %29 = vector.load %arg6[%c0_24, %c0_25] : memref<8x8xf32, #tpu.memory_space<vmem>>, vector<8x8xf32>
    %c0_26 = arith.constant 0 : index
    %c128 = arith.constant 128 : index
    %30 = vector.load %arg7[%c0_26, %c128] : memref<8x256xf32, #tpu.memory_space<vmem>>, vector<8x128xf32>
    %cst_27 = arith.constant dense<0.000000e+00> : vector<8x128xf32>
    %31 = tpu.matmul %29, %30, %cst_27 {dimension_numbers = #tpu.dot_dimension_numbers<[1], [0], [0], [1], [0, 0, 1, 1], [], []>} : vector<8x8xf32>, vector<8x128xf32>, vector<8x128xf32> -> vector<8x128xf32>
    %32 = arith.mulf %28, %25 : vector<8x128xf32>
    %c3 = arith.constant 3 : index
    %c0_28 = arith.constant 0 : index
    %33 = vector.load %arg9[%c3, %c0_28] : memref<4x128xf32, #tpu.memory_space<vmem>>, vector<1x128xf32>
    %34 = vector.broadcast %33 : vector<1x128xf32> to vector<8x128xf32>
    %35 = arith.mulf %31, %34 : vector<8x128xf32>
    %c0_29 = arith.constant 0 : index
    %c0_30 = arith.constant 0 : index
    %36 = vector.load %arg9[%c0_29, %c0_30] : memref<4x128xf32, #tpu.memory_space<vmem>>, vector<1x128xf32>
    %37 = vector.broadcast %36 : vector<1x128xf32> to vector<8x128xf32>
    %38 = arith.addf %35, %37 : vector<8x128xf32>
    %39 = arith.addf %32, %38 : vector<8x128xf32>
    %c0_31 = arith.constant 0 : index
    %c0_32 = arith.constant 0 : index
    %40 = vector.load %arg10[%c0_31, %c0_32] : memref<128x128xf32, #tpu.memory_space<vmem>>, vector<128x128xf32>
    %cst_33 = arith.constant dense<0.000000e+00> : vector<8x128xf32>
    %41 = tpu.matmul %39, %40, %cst_33 {dimension_numbers = #tpu.dot_dimension_numbers<[1], [0], [0], [1], [0, 0, 1, 1], [], []>} : vector<8x128xf32>, vector<128x128xf32>, vector<8x128xf32> -> vector<8x128xf32>
    %42 = arith.subf %39, %41 : vector<8x128xf32>
    %43 = arith.mulf %42, %42 : vector<8x128xf32>
    %c0_34 = arith.constant 0 : index
    %c0_35 = arith.constant 0 : index
    %44 = vector.load %arg10[%c0_34, %c0_35] : memref<128x128xf32, #tpu.memory_space<vmem>>, vector<128x128xf32>
    %cst_36 = arith.constant dense<0.000000e+00> : vector<8x128xf32>
    %45 = tpu.matmul %43, %44, %cst_36 {dimension_numbers = #tpu.dot_dimension_numbers<[1], [0], [0], [1], [0, 0, 1, 1], [], []>} : vector<8x128xf32>, vector<128x128xf32>, vector<8x128xf32> -> vector<8x128xf32>
    %cst_37 = arith.constant 9.99999974E-6 : f32
    %46 = vector.broadcast %cst_37 : f32 to vector<8x128xf32>
    %47 = arith.addf %45, %46 : vector<8x128xf32>
    %48 = math.rsqrt %47 : vector<8x128xf32>
    %49 = arith.mulf %42, %48 : vector<8x128xf32>
    %c1_38 = arith.constant 1 : index
    %c0_39 = arith.constant 0 : index
    %50 = vector.load %arg9[%c1_38, %c0_39] : memref<4x128xf32, #tpu.memory_space<vmem>>, vector<1x128xf32>
    %51 = vector.broadcast %50 : vector<1x128xf32> to vector<8x128xf32>
    %52 = arith.mulf %49, %51 : vector<8x128xf32>
    %c2_40 = arith.constant 2 : index
    %c0_41 = arith.constant 0 : index
    %53 = vector.load %arg9[%c2_40, %c0_41] : memref<4x128xf32, #tpu.memory_space<vmem>>, vector<1x128xf32>
    %54 = vector.broadcast %53 : vector<1x128xf32> to vector<8x128xf32>
    %55 = arith.addf %52, %54 : vector<8x128xf32>
    %c0_42 = arith.constant 0 : index
    %c0_43 = arith.constant 0 : index
    %56 = vector.load %arg11[%c0_42, %c0_43] : memref<8x128xf32, #tpu.memory_space<vmem>>, vector<8x128xf32>
    tpu.vector_store %arg11[%c0_42, %c0_43], %55 {strides = array<i32>} : memref<8x128xf32, #tpu.memory_space<vmem>>, vector<8x128xf32>,
    return
  }
  func.func @transform_0(%arg0: i32) -> (i32, i32) {
    %c0_i32 = arith.constant 0 : i32
    %c0_i32_0 = arith.constant 0 : i32
    return %arg0, %c0_i32 : i32, i32
  }
  func.func @transform_1(%arg0: i32) -> (i32, i32) {
    %c0_i32 = arith.constant 0 : i32
    %c0_i32_0 = arith.constant 0 : i32
    return %arg0, %c0_i32 : i32, i32
  }
  func.func @transform_2(%arg0: i32) -> (i32, i32) {
    %c0_i32 = arith.constant 0 : i32
    %c0_i32_0 = arith.constant 0 : i32
    %c0_i32_1 = arith.constant 0 : i32
    return %c0_i32, %c0_i32_0 : i32, i32
  }
  func.func @transform_3(%arg0: i32) -> (i32, i32) {
    %c0_i32 = arith.constant 0 : i32
    %c0_i32_0 = arith.constant 0 : i32
    %c0_i32_1 = arith.constant 0 : i32
    return %c0_i32, %c0_i32_0 : i32, i32
  }
  func.func @transform_4(%arg0: i32) -> (i32, i32) {
    %c0_i32 = arith.constant 0 : i32
    %c0_i32_0 = arith.constant 0 : i32
    %c0_i32_1 = arith.constant 0 : i32
    return %c0_i32, %c0_i32_0 : i32, i32
  }
  func.func @transform_5(%arg0: i32) -> (i32, i32) {
    %c0_i32 = arith.constant 0 : i32
    %c0_i32_0 = arith.constant 0 : i32
    return %arg0, %c0_i32 : i32, i32
  }
  func.func @transform_6(%arg0: i32) -> (i32, i32) {
    %c0_i32 = arith.constant 0 : i32
    %c0_i32_0 = arith.constant 0 : i32
    %c0_i32_1 = arith.constant 0 : i32
    return %c0_i32, %c0_i32_0 : i32, i32
  }
  func.func @transform_7(%arg0: i32) -> (i32, i32) {
    %c0_i32 = arith.constant 0 : i32
    %c0_i32_0 = arith.constant 0 : i32
    %c0_i32_1 = arith.constant 0 : i32
    return %c0_i32, %c0_i32_0 : i32, i32
  }
  func.func @transform_8(%arg0: i32) -> (i32, i32) {
    %c0_i32 = arith.constant 0 : i32
    %c0_i32_0 = arith.constant 0 : i32
    %c0_i32_1 = arith.constant 0 : i32
    return %c0_i32, %c0_i32_0 : i32, i32
  }
  func.func @transform_9(%arg0: i32) -> (i32, i32) {
    %c0_i32 = arith.constant 0 : i32
    %c0_i32_0 = arith.constant 0 : i32
    %c0_i32_1 = arith.constant 0 : i32
    return %c0_i32, %c0_i32_0 : i32, i32
  }
  func.func @transform_10(%arg0: i32) -> (i32, i32) {
    %c0_i32 = arith.constant 0 : i32
    %c0_i32_0 = arith.constant 0 : i32
    return %arg0, %c0_i32 : i32, i32
  }
}

</mosaic_0001>

<bundles_post_ra>
// kernel: tile.30
= control target key start
LH: loop header
LB: loop body
LE: loop exit
PB: predicated region body
PF: predicated region fallthrough
CT: control target
= control target key end

     0   :  { %vm35_vm0 = vcmask 1045507   ;;  %s20_s12 = smov 3  ;;  %s26_s13 = smov 3  ;;  %vm17_vm1 = vcmask 523264   ;;  %vm39_vm2 = vcmask 1048064   ;;  %s85_s0 = inlined_call_operand.vmem [shape: f32[3,4,64], index: 0, kind: input, shape index: {}]   ;;  %s86_s1 = inlined_call_operand.vmem [shape: f32[3,256], index: 1, kind: output, shape index: {}]  }
   0x1   :  { %v55_v0 = vld [vmem:[%s85_s0 + $0x8] sm:$0xf]  ;;  %v56_v1 = vld [vmem:[%s85_s0 + $0x4] sm:$0xf]  ;;  %v13_v2 = vld [vmem:[%s85_s0] sm:$0xf] }
   0x2   :  { %8 = vst [vmem:[#allocation1 + $0x10] sm:$0xf] %v55_v0  ;;  %12 = vst [vmem:[#allocation1 + $0x8] sm:$0xf] %v56_v1  ;;  %s15_s0 = smov 3  ;;  %s59_s14 = smov 64  }
   0x3   :  { %14 = vst [vmem:[#allocation1] sm:$0xf] %v13_v2 }
   0x9   :  { %v21_v7 = vld [vmem:[#allocation1 + $0x8] ss:$2 sm:%s20_s12]  }
   0xa   :  { %v32_v3 = vld [vmem:[#allocation1 + $0x1] ss:$8 sm:$0x7]   ;;  %v34_v4 = vld [vmem:[#allocation1 - $0x15] ss:$8 sm:$0x38]  }
   0xb   :  { %v36_v5 = vsel %vm35_vm0, %v34_v4, %v32_v3  ;;  %v16_v6 = vld [vmem:[#allocation1] ss:$2 sm:%s15_s0]   ;;  %v27_v8 = vld [vmem:[#allocation1 + $0x10] ss:$2 sm:%s26_s13]  }
   0xc   :  { %37 = vrot.lane.b32.xlu0 %v36_v5, %s59_s14  ;;  %18 = vst.msk [vmem:[#allocation0] ss:$8 sm:$0x3] %vm17_vm1, %v16_v6   ;;  %24 = vst.msk [vmem:[#allocation0 + $0x1] ss:$8 sm:$0x3] %vm17_vm1, %v21_v7  }
   0xd   :  { %30 = vst.msk [vmem:[#allocation0 + $0x2] ss:$8 sm:$0x3] %vm17_vm1, %v27_v8  }
  0x7e   :  { %v38_v9 = vpop.permute.xlu0 %37  }
  0x7f   :  { %40 = vst.msk [vmem:[#allocation0] sm:$0x7] %vm39_vm2, %v38_v9   ;;  %42 = vst.msk [vmem:[#allocation0 + $0x5] sm:$0x38] %vm39_vm2, %v38_v9  }
  0x86   :  { %v46_v10 = vld [vmem:[#allocation0] sm:$0xf]  ;;  %v50_v11 = vld [vmem:[#allocation0 + $0x8] sm:$0xf] }
  0x87   :  { %48 = vst [vmem:[%s86_s1] sm:$0xf] %v46_v10  ;;  %57 = vst [vmem:[%s86_s1 + $0x4] sm:$0xf] %v50_v11 }

// kernel: tile.24
= control target key start
LH: loop header
LB: loop body
LE: loop exit
PB: predicated region body
PF: predicated region fallthrough
CT: control target
= control target key end

     0   :  { %s22_s0 = inlined_call_operand.vmem [shape: f32[8], index: 0, kind: input, shape index: {}]   ;;  %s23_s1 = inlined_call_operand.vmem [shape: f32[2,8], index: 1, kind: output, shape index: {}]  }
   0x1   :  { %v4_v0 = vld [vmem:[%s22_s0] ss:$0 sm:$0xff] }
   0x2   :  { %5 = vst [vmem:[%s23_s1] sm:$0x3] %v4_v0 }

// kernel: tile.25
= control target key start
LH: loop header
LB: loop body
LE: loop exit
PB: predicated region body
PF: predicated region fallthrough
CT: control target
= control target key end

     0   :  { %vm7_vm0 = vcmask 64512   ;;  %vm13_vm1 = vcmask 130112   ;;  %s39_s0 = inlined_call_operand.vmem [shape: f32[2,8], index: 0, kind: input, shape index: {}]   ;;  %s40_s1 = inlined_call_operand.vmem [shape: f32[16], index: 1, kind: output, shape index: {}]  }
   0x1   :  { %v4_v0 = vld [vmem:[%s39_s0] sm:$0x3]  ;;  %s22_s0 = smov 8  }
   0x2   :  { %5 = vst [vmem:[#allocation1] sm:$0x3] %v4_v0 }
   0x9   :  { %v10_v1 = vld [vmem:[#allocation1 + $0x1] sm:$0x1]   ;;  %v6_v2 = vld [vmem:[#allocation1] sm:$0x1]  }
   0xa   :  { %11 = vrot.lane.b32.xlu0 %v10_v1, %s22_s0  ;;  %8 = vst.msk [vmem:[#allocation0] sm:$0x1] %vm7_vm0, %v6_v2  }
  0x7c   :  { %v12_v3 = vpop.permute.xlu0 %11  }
  0x7d   :  { %14 = vst.msk [vmem:[#allocation0] sm:$0x1] %vm13_vm1, %v12_v3  }
  0x84   :  { %v18_v4 = vld [vmem:[#allocation0] sm:$0x1] }
  0x85   :  { %20 = vst [vmem:[%s40_s1] sm:$0x1] %v18_v4 }

// kernel: tile.35
= control target key start
LH: loop header
LB: loop body
LE: loop exit
PB: predicated region body
PF: predicated region fallthrough
CT: control target
= control target key end

     0   :  { %vm21_vm0 = vcmask 261120   ;;  %s56_s14 = smov 32   ;;  %s57_s15 = smov 64   ;;  %vm27_vm1 = vcmask 1048320   ;;  %vm33_vm2 = vcmask 785920   ;;  %vm39_vm3 = vcmask 523520   ;;  %s83_s0 = inlined_call_operand.vmem [shape: f32[4,4,32], index: 0, kind: input, shape index: {}]   ;;  %s84_s1 = inlined_call_operand.vmem [shape: f32[4,128], index: 1, kind: output, shape index: {}]  }
   0x1   :  { %v49_v0 = vld [vmem:[%s83_s0 + $0xc] sm:$0xf]  ;;  %v50_v1 = vld [vmem:[%s83_s0 + $0x8] sm:$0xf]  ;;  %v51_v2 = vld [vmem:[%s83_s0 + $0x4] sm:$0xf] }
   0x2   :  { %8 = vst [vmem:[#allocation1 + $0x18] sm:$0xf] %v49_v0  ;;  %13 = vst [vmem:[#allocation1 + $0x10] sm:$0xf] %v50_v1  ;;  %v18_v3 = vld [vmem:[%s83_s0] sm:$0xf] }
   0x3   :  { %17 = vst [vmem:[#allocation1 + $0x8] sm:$0xf] %v51_v2  ;;  %19 = vst [vmem:[#allocation1] sm:$0xf] %v18_v3  ;;  %s55_s0 = smov 96  }
   0xa   :  { %v24_v4 = vld [vmem:[#allocation1 + $0x3] ss:$8 sm:$0xf]   ;;  %v36_v5 = vld [vmem:[#allocation1 + $0x1] ss:$8 sm:$0xf]  }
   0xb   :  { %25 = vrot.lane.b32.xlu0 %v24_v4, %s55_s0  ;;  %v20_v6 = vld [vmem:[#allocation1] ss:$8 sm:$0xf]   ;;  %v30_v7 = vld [vmem:[#allocation1 + $0x2] ss:$8 sm:$0xf]   ;;  %37 = vrot.lane.b32.xlu1 %v36_v5, %s56_s14 }
   0xc   :  { %22 = vst.msk [vmem:[#allocation0] sm:$0xf] %vm21_vm0, %v20_v6  }
   0xf   :  { %31 = vrot.lane.b32.xlu0 %v30_v7, %s57_s15 }
  0x7d   :  { %v26_v8 = vpop.permute.xlu0 %25   ;;  %v38_v9 = vpop.permute.xlu1 %37  }
  0x7e   :  { %28 = vst.msk [vmem:[#allocation0] sm:$0xf] %vm27_vm1, %v26_v8  }
  0x81   :  { %v32_v10 = vpop.permute.xlu0 %31  }
  0x82   :  { %34 = vst.msk [vmem:[#allocation0] sm:$0xf] %vm33_vm2, %v32_v10  }
  0x83   :  { %40 = vst.msk [vmem:[#allocation0] sm:$0xf] %vm39_vm3, %v38_v9  }
  0x8a   :  { %v44_v11 = vld [vmem:[#allocation0] sm:$0xf] }
  0x8b   :  { %46 = vst [vmem:[%s84_s1] sm:$0xf] %v44_v11 }

// kernel: nonverbal_condition.1
= control target key start
LH: loop header
LB: loop body
LE: loop exit
PB: predicated region body
PF: predicated region fallthrough
CT: control target
= control target key end

     0   :  { %vm99_vm0 = vcmask 457728   ;;  %vm1282_vm1 = vmmov 0   ;;  %vm522_vm2 = vcmask 64512   ;;  %s1980_s2 = inlined_call_operand.vmem [shape: f32[184,256], index: 2, kind: input, shape index: {}]   ;;  %s1981_s0 = inlined_call_operand.vmem [shape: f32[8,184], index: 0, kind: input, shape index: {}]   ;;  %s1982_s1 = inlined_call_operand.vmem [shape: f32[8,184], index: 1, kind: input, shape index: {}]   ;;  %s1983_s3 = inlined_call_operand.vmem [shape: f32[256,256], index: 3, kind: input, shape index: {}]   ;;  %s1984_s4 = inlined_call_operand.vmem [shape: f32[3,256], index: 4, kind: input, shape index: {}]   ;;  %s1985_s7 = inlined_call_operand.vmem [shape: f32[256,128], index: 7, kind: input, shape index: {}]   ;;  %s1986_s9 = inlined_call_operand.vmem [shape: f32[128,128], index: 9, kind: input, shape index: {}]   ;;  %s1987_s6 = inlined_call_operand.vmem [shape: f32[8,256], index: 6, kind: input, shape index: {}]   ;;  %s1988_s5 = inlined_call_operand.vmem [shape: f32[8,8], index: 5, kind: input, shape index: {}]   ;;  %s1989_s8 = inlined_call_operand.vmem [shape: f32[4,128], index: 8, kind: input, shape index: {}]   ;;  %s1990_s10 = inlined_call_operand.vmem [shape: f32[8,128], index: 10, kind: output, shape index: {}]  }
   0x1   :  { %v42_v0 = vld [vmem:[%s1980_s2 + $0x8] sm:$0xff]  ;;  %v44_v1 = vld [vmem:[%s1980_s2 + $0x18] sm:$0xff]  ;;  %v41_v2 = vld [vmem:[%s1980_s2] sm:$0xff] }
   0x2   :  { %v1020_v3 = vpack.c.bf16 %v44_v1, %v42_v0  ;;  %v43_v4 = vld [vmem:[%s1980_s2 + $0x10] sm:$0xff]  ;;  %v46_v5 = vld [vmem:[%s1980_s2 + $0x28] sm:$0xff]  ;;  %v48_v6 = vld [vmem:[%s1980_s2 + $0x38] sm:$0xff] }
   0x3   :  { %v1022_v7 = vpack.c.bf16 %v43_v4, %v41_v2  ;;  %v1024_v8 = vpack.c.bf16 %v48_v6, %v46_v5  ;;  %v45_v9 = vld [vmem:[%s1980_s2 + $0x20] sm:$0xff]  ;;  %v47_v10 = vld [vmem:[%s1980_s2 + $0x30] sm:$0xff]  ;;  %v50_v11 = vld [vmem:[%s1980_s2 + $0x48] sm:$0xff] }
   0x4   :  { %1021 = vmatprep.subr.bf16.mxu0 %v1020_v3  ;;  %v52_v12 = vld [vmem:[%s1980_s2 + $0x58] sm:$0xff]  ;;  %v1026_v13 = vpack.c.bf16 %v47_v10, %v45_v9  ;;  %v49_v15 = vld [vmem:[%s1980_s2 + $0x40] sm:$0xff]  ;;  %v51_v16 = vld [vmem:[%s1980_s2 + $0x50] sm:$0xff] }
   0x5   :  { %1023 = vmatpush1.bf16.msra.mxu0 %v1022_v7  ;;  %v1028_v14 = vpack.c.bf16 %v52_v12, %v50_v11  ;;  %v54_v17 = vld [vmem:[%s1980_s2 + $0x68] sm:$0xff]  ;;  %v56_v18 = vld [vmem:[%s1980_s2 + $0x78] sm:$0xff]  ;;  %v1030_v19 = vpack.c.bf16 %v51_v16, %v49_v15  ;;  %v53_v21 = vld [vmem:[%s1980_s2 + $0x60] sm:$0xff] }
   0x6   :  { %1025 = vmatprep.subr.bf16.mxu0 %v1024_v8  ;;  %v1032_v20 = vpack.c.bf16 %v56_v18, %v54_v17  ;;  %v55_v22 = vld [vmem:[%s1980_s2 + $0x70] sm:$0xff]  ;;  %v58_v23 = vld [vmem:[%s1980_s2 + $0x88] sm:$0xff]  ;;  %v60_v24 = vld [vmem:[%s1980_s2 + $0x98] sm:$0xff] }
   0x7   :  { %v1034_v25 = vpack.c.bf16 %v55_v22, %v53_v21  ;;  %v1036_v26 = vpack.c.bf16 %v60_v24, %v58_v23  ;;  %v57_v27 = vld [vmem:[%s1980_s2 + $0x80] sm:$0xff]  ;;  %v59_v28 = vld [vmem:[%s1980_s2 + $0x90] sm:$0xff]  ;;  %v62_v29 = vld [vmem:[%s1980_s2 + $0xa8] sm:$0xff] }
   0x8   :  { %v64_v30 = vld [vmem:[%s1980_s2 + $0xb8] sm:$0xff]  ;;  %v61_v31 = vld [vmem:[%s1980_s2 + $0xa0] sm:$0xff]  ;;  %v63_v32 = vld [vmem:[%s1980_s2 + $0xb0] sm:$0xff]  ;;  %v1038_v34 = vpack.c.bf16 %v59_v28, %v57_v27 }
   0x9   :  { %1027 = vmatpush1.bf16.msra.mxu0 %v1026_v13  ;;  %v36_v33 = vld [vmem:[%s1981_s0 + $0x8] sm:$0xff]  ;;  %v68_v36 = vld [vmem:[%s1980_s2 + $0xd8] sm:$0xff]  ;;  %v1040_v39 = vpack.c.bf16 %v64_v30, %v62_v29  ;;  %v174_v42 = vld [vmem:[%s1983_s3] sm:$0xff]  ;;  %v1042_v53 = vpack.c.bf16 %v63_v32, %v61_v31 }
   0xa   :  { %1029 = vmatprep.subr.bf16.mxu0 %v1028_v14  ;;  %v66_v35 = vld [vmem:[%s1980_s2 + $0xc8] sm:$0xff]  ;;  %v177_v41 = vld [vmem:[%s1983_s3 + $0x18] sm:$0xff]  ;;  %v176_v43 = vld [vmem:[%s1983_s3 + $0x10] sm:$0xff] }
   0xb   :  { %v38_v37 = vld [vmem:[%s1982_s1 + $0x8] sm:$0xff]  ;;  %v1437_v45 = vpack.c.bf16 %v176_v43, %v174_v42  ;;  %v181_v47 = vld [vmem:[%s1983_s3 + $0x38] sm:$0xff]  ;;  %v178_v48 = vld [vmem:[%s1983_s3 + $0x20] sm:$0xff]  ;;  %v1044_v54 = vpack.c.bf16 %v68_v36, %v66_v35 }
   0xc   :  { %v175_v38 = vld [vmem:[%s1983_s3 + $0x8] sm:$0xff]  ;;  %v40_v40 = vadd.f32 %v38_v37, %v36_v33  ;;  %v180_v50 = vld [vmem:[%s1983_s3 + $0x30] sm:$0xff]  ;;  %v185_v52 = vld [vmem:[%s1983_s3 + $0x58] sm:$0xff] }
   0xd   :  { %1031 = vmatpush1.bf16.msra.mxu0 %v1030_v19  ;;  %v1435_v44 = vpack.c.bf16 %v177_v41, %v175_v38  ;;  %v179_v46 = vld [vmem:[%s1983_s3 + $0x28] sm:$0xff]  ;;  %v65_v55 = vld [vmem:[%s1980_s2 + $0xc0] sm:$0xff]  ;;  %v67_v56 = vld [vmem:[%s1980_s2 + $0xd0] sm:$0xff]  ;;  %v1470_v58 = vpack.c.bf16 %v180_v50, %v178_v48 }
   0xe   :  { %1033 = vmatprep.subr.bf16.mxu0 %v1032_v20  ;;  %858 = vmatprep.mubr.msk.f32.mxu0 %vm99_vm0, %v40_v40  ;;  %v1448_v49 = vpack.c.bf16 %v181_v47, %v179_v46  ;;  %v183_v51 = vld [vmem:[%s1983_s3 + $0x48] sm:$0xff]  ;;  %v72_v59 = vld [vmem:[%s1980_s2 + $0xf8] sm:$0xff]  ;;  %v182_v61 = vld [vmem:[%s1983_s3 + $0x40] sm:$0xff]  ;;  %v1046_v1 = vpack.c.bf16 %v67_v56, %v65_v55 }
   0xf   :  { %1065 = vmatprep.subr.bf16.mxu1 %v1435_v44  ;;  %v70_v57 = vld [vmem:[%s1980_s2 + $0xe8] sm:$0xff]  ;;  %v1476_v60 = vpack.c.bf16 %v185_v52, %v183_v51  ;;  %v184_v62 = vld [vmem:[%s1983_s3 + $0x50] sm:$0xff]  ;;  %v189_v0 = vld [vmem:[%s1983_s3 + $0x78] sm:$0xff] }
  0x10   :  { %1067 = vmatpush1.bf16.msra.mxu1 %v1437_v45  ;;  %v187_v63 = vld [vmem:[%s1983_s3 + $0x68] sm:$0xff]  ;;  %v1048_v2 = vpack.c.bf16 %v72_v59, %v70_v57  ;;  %v69_v3 = vld [vmem:[%s1980_s2 + $0xe0] sm:$0xff]  ;;  %v71_v4 = vld [vmem:[%s1980_s2 + $0xf0] sm:$0xff]  ;;  %v1500_v6 = vpack.c.bf16 %v184_v62, %v182_v61 }
  0x11   :  { %1035 = vmatpush1.bf16.msra.mxu0 %v1034_v25  ;;  %1069 = vmatprep.subr.bf16.mxu1 %v1448_v49  ;;  %v74_v5 = vld [vmem:[%s1980_s2 + $0x108] sm:$0xff]  ;;  %v76_v7 = vld [vmem:[%s1980_s2 + $0x118] sm:$0xff]  ;;  %v1506_v8 = vpack.c.bf16 %v189_v0, %v187_v63  ;;  %v186_v9 = vld [vmem:[%s1983_s3 + $0x60] sm:$0xff]  ;;  %v1050_v13 = vpack.c.bf16 %v71_v4, %v69_v3 }
  0x12   :  { %1037 = vmatprep.subr.bf16.mxu0 %v1036_v26  ;;  %v188_v10 = vld [vmem:[%s1983_s3 + $0x70] sm:$0xff]  ;;  %v191_v11 = vld [vmem:[%s1983_s3 + $0x88] sm:$0xff]  ;;  %v193_v12 = vld [vmem:[%s1983_s3 + $0x98] sm:$0xff]  ;;  %v1052_v14 = vpack.c.bf16 %v76_v7, %v74_v5 }
  0x13   :  { %v73_v15 = vld [vmem:[%s1980_s2 + $0x100] sm:$0xff]  ;;  %v75_v16 = vld [vmem:[%s1980_s2 + $0x110] sm:$0xff]  ;;  %v78_v17 = vld [vmem:[%s1980_s2 + $0x128] sm:$0xff]  ;;  %v1530_v18 = vpack.c.bf16 %v188_v10, %v186_v9  ;;  %v1536_v20 = vpack.c.bf16 %v193_v12, %v191_v11 }
  0x14   :  { %1071 = vmatpush1.bf16.msra.mxu1 %v1470_v58  ;;  %v80_v19 = vld [vmem:[%s1980_s2 + $0x138] sm:$0xff]  ;;  %v190_v21 = vld [vmem:[%s1983_s3 + $0x80] sm:$0xff]  ;;  %v192_v22 = vld [vmem:[%s1983_s3 + $0x90] sm:$0xff]  ;;  %v1054_v25 = vpack.c.bf16 %v75_v16, %v73_v15 }
  0x15   :  { %1039 = vmatpush1.bf16.msra.mxu0 %v1038_v34  ;;  %1073 = vmatprep.subr.bf16.mxu1 %v1476_v60  ;;  %v195_v23 = vld [vmem:[%s1983_s3 + $0xa8] sm:$0xff]  ;;  %v197_v24 = vld [vmem:[%s1983_s3 + $0xb8] sm:$0xff]  ;;  %v1056_v26 = vpack.c.bf16 %v80_v19, %v78_v17  ;;  %v77_v27 = vld [vmem:[%s1980_s2 + $0x120] sm:$0xff]  ;;  %v1560_v30 = vpack.c.bf16 %v192_v22, %v190_v21 }
  0x16   :  { %1041 = vmatprep.subr.bf16.mxu0 %v1040_v39  ;;  %v79_v28 = vld [vmem:[%s1980_s2 + $0x130] sm:$0xff]  ;;  %v82_v29 = vld [vmem:[%s1980_s2 + $0x148] sm:$0xff]  ;;  %v84_v31 = vld [vmem:[%s1980_s2 + $0x158] sm:$0xff]  ;;  %v1566_v32 = vpack.c.bf16 %v197_v24, %v195_v23 }
  0x17   :  { %v194_v33 = vld [vmem:[%s1983_s3 + $0xa0] sm:$0xff]  ;;  %v196_v34 = vld [vmem:[%s1983_s3 + $0xb0] sm:$0xff]  ;;  %v199_v35 = vld [vmem:[%s1983_s3 + $0xc8] sm:$0xff]  ;;  %v1058_v37 = vpack.c.bf16 %v79_v28, %v77_v27  ;;  %v1060_v38 = vpack.c.bf16 %v84_v31, %v82_v29 }
  0x18   :  { %1075 = vmatpush1.bf16.msra.mxu1 %v1500_v6  ;;  %v201_v36 = vld [vmem:[%s1983_s3 + $0xd8] sm:$0xff]  ;;  %v81_v39 = vld [vmem:[%s1980_s2 + $0x140] sm:$0xff]  ;;  %v83_v40 = vld [vmem:[%s1980_s2 + $0x150] sm:$0xff]  ;;  %v1587_v41 = vpack.c.bf16 %v196_v34, %v194_v33 }
  0x19   :  { %1043 = vmatpush1.bf16.msra.mxu0 %v1042_v53  ;;  %1077 = vmatprep.subr.bf16.mxu1 %v1506_v8  ;;  %v1590_v42 = vpack.c.bf16 %v201_v36, %v199_v35  ;;  %v198_v43 = vld [vmem:[%s1983_s3 + $0xc0] sm:$0xff]  ;;  %v200_v46 = vld [vmem:[%s1983_s3 + $0xd0] sm:$0xff]  ;;  %v203_v47 = vld [vmem:[%s1983_s3 + $0xe8] sm:$0xff]  ;;  %v1062_v50 = vpack.c.bf16 %v83_v40, %v81_v39 }
  0x1a   :  { %1045 = vmatprep.subr.bf16.mxu0 %v1044_v54  ;;  %v205_v48 = vld [vmem:[%s1983_s3 + $0xf8] sm:$0xff]  ;;  %v86_v51 = vld [vmem:[%s1980_s2 + $0x168] sm:$0xff]  ;;  %v35_v52 = vld [vmem:[%s1981_s0] sm:$0xff]  ;;  %v1611_v53 = vpack.c.bf16 %v200_v46, %v198_v43 }
  0x1b   :  { %v37_v54 = vld [vmem:[%s1982_s1] sm:$0xff]  ;;  %v1617_v55 = vpack.c.bf16 %v205_v48, %v203_v47  ;;  %v204_v57 = vld [vmem:[%s1983_s3 + $0xf0] sm:$0xff]  ;;  %v207_v59 = vld [vmem:[%s1983_s3 + $0x108] sm:$0xff] }
  0x1c   :  { %1079 = vmatpush1.bf16.msra.mxu1 %v1530_v18  ;;  %v202_v56 = vld [vmem:[%s1983_s3 + $0xe0] sm:$0xff]  ;;  %v209_v61 = vld [vmem:[%s1983_s3 + $0x118] sm:$0xff]  ;;  %v39_v63 = vadd.f32 %v37_v54, %v35_v52  ;;  %v208_v3 = vld [vmem:[%s1983_s3 + $0x110] sm:$0xff] }
  0x1d   :  { %1047 = vmatpush1.bf16.msra.mxu0 %v1046_v1  ;;  %1081 = vmatprep.subr.bf16.mxu1 %v1536_v20  ;;  %v85_v62 = vld [vmem:[%s1980_s2 + $0x160] sm:$0xff]  ;;  %v1635_v0 = vpack.c.bf16 %v204_v57, %v202_v56  ;;  %v1638_v1 = vpack.c.bf16 %v209_v61, %v207_v59  ;;  %v211_v4 = vld [vmem:[%s1983_s3 + $0x128] sm:$0xff]  ;;  %v213_v5 = vld [vmem:[%s1983_s3 + $0x138] sm:$0xff] }
  0x1e   :  { %1049 = vmatprep.subr.bf16.mxu0 %v1048_v2  ;;  %v206_v2 = vld [vmem:[%s1983_s3 + $0x100] sm:$0xff]  ;;  %v1656_v9 = vpack.c.bf16 %v213_v5, %v211_v4  ;;  %v212_v11 = vld [vmem:[%s1983_s3 + $0x130] sm:$0xff]  ;;  %v215_v12 = vld [vmem:[%s1983_s3 + $0x148] sm:$0xff] }
  0x1f   :  { %v1653_v7 = vpack.c.bf16 %v208_v3, %v206_v2  ;;  %v210_v10 = vld [vmem:[%s1983_s3 + $0x120] sm:$0xff]  ;;  %v216_v16 = vld [vmem:[%s1983_s3 + $0x150] sm:$0xff]  ;;  %v223_v23 = vld [vmem:[%s1983_s3 + $0x188] sm:$0xff] }
  0x20   :  { %1083 = vmatpush1.bf16.msra.mxu1 %v1560_v30  ;;  %v218_v21 = vld [vmem:[%s1983_s3 + $0x160] sm:$0xff]  ;;  %v220_v22 = vld [vmem:[%s1983_s3 + $0x170] sm:$0xff]  ;;  %v227_v27 = vld [vmem:[%s1983_s3 + $0x1a8] sm:$0xff] }
  0x21   :  { %1051 = vmatpush1.bf16.msra.mxu0 %v1050_v13  ;;  %1085 = vmatprep.subr.bf16.mxu1 %v1566_v32  ;;  %v217_v13 = vld [vmem:[%s1983_s3 + $0x158] sm:$0xff]  ;;  %v226_v29 = vld [vmem:[%s1983_s3 + $0x1a0] sm:$0xff]  ;;  %v228_v31 = vld [vmem:[%s1983_s3 + $0x1b0] sm:$0xff] }
  0x22   :  { %1053 = vmatprep.subr.bf16.mxu0 %v1052_v14  ;;  %v1102_v14 = vpack.c.bf16 %v212_v11, %v210_v10  ;;  %v1104_v15 = vpack.c.bf16 %v217_v13, %v215_v12  ;;  %v231_v33 = vld [vmem:[%s1983_s3 + $0x1c8] sm:$0xff]  ;;  %v230_v35 = vld [vmem:[%s1983_s3 + $0x1c0] sm:$0xff]  ;;  %v232_v36 = vld [vmem:[%s1983_s3 + $0x1d0] sm:$0xff] }
  0x23   :  { %v234_v39 = vld [vmem:[%s1983_s3 + $0x1e0] sm:$0xff]  ;;  %v236_v40 = vld [vmem:[%s1983_s3 + $0x1f0] sm:$0xff]  ;;  %v435_v57 = vld [vmem:[%s1985_s7 + $0x88] sm:$0xff] }
  0x24   :  { %1087 = vmatpush1.bf16.msra.mxu1 %v1587_v41  ;;  %v87_v47 = vld [vmem:[%s1984_s4] ss:$4 sm:$0x3]  ;;  %v420_v3 = vld [vmem:[%s1985_s7 + $0x10] sm:$0xff]  ;;  %v421_v4 = vld [vmem:[%s1985_s7 + $0x18] sm:$0xff] }
  0x25   :  { %1055 = vmatpush1.bf16.msra.mxu0 %v1054_v25  ;;  %1089 = vmatprep.subr.bf16.mxu1 %v1590_v42  ;;  %v222_v25 = vld [vmem:[%s1983_s3 + $0x180] sm:$0xff]  ;;  %v423_v12 = vld [vmem:[%s1985_s7 + $0x28] sm:$0xff] }
  0x26   :  { %1057 = vmatprep.subr.bf16.mxu0 %v1056_v26  ;;  %v224_v26 = vld [vmem:[%s1983_s3 + $0x190] sm:$0xff]  ;;  %v434_v56 = vld [vmem:[%s1985_s7 + $0x80] sm:$0xff] }
  0x27   :  { %v418_v59 = vld [vmem:[%s1985_s7] sm:$0xff]  ;;  %v1192_v61 = vpack.c.bf16 %v435_v57, %v434_v56  ;;  %v686_v57 = vld [vmem:[%s1986_s9 + $0x28] sm:$0xff] }
  0x28   :  { %1091 = vmatpush1.bf16.msra.mxu1 %v1611_v53  ;;  %v438_v5 = vld [vmem:[%s1985_s7 + $0xa0] sm:$0xff] }
  0x29   :  { %1059 = vmatpush1.bf16.msra.mxu0 %v1058_v37  ;;  %1093 = vmatprep.subr.bf16.mxu1 %v1617_v55  ;;  %v237_v37 = vld [vmem:[%s1983_s3 + $0x1f8] sm:$0xff]  ;;  %v422_v11 = vld [vmem:[%s1985_s7 + $0x20] sm:$0xff] }
  0x2a   :  { %1061 = vmatprep.subr.bf16.mxu0 %v1060_v38  ;;  %v1202_v13 = vpack.c.bf16 %v423_v12, %v422_v11  ;;  %v685_v56 = vld [vmem:[%s1986_s9 + $0x20] sm:$0xff] }
  0x2c   :  { %1095 = vmatpush1.bf16.msra.mxu1 %v1635_v0 }
  0x2d   :  { %1063 = vmatpush1.bf16.msra.mxu0 %v1062_v50  ;;  %1097 = vmatprep.subr.bf16.mxu1 %v1638_v1 }
  0x2e   :  { %147 = vmatprep.subr.mxu0 %v86_v51 }
  0x30   :  { %1099 = vmatpush1.bf16.msra.mxu1 %v1653_v7 }
  0x31   :  { %148 = vmatpush1.msra.mxu0 %v85_v62  ;;  %1101 = vmatprep.subr.bf16.mxu1 %v1656_v9  ;;  %v419_v62 = vld [vmem:[%s1985_s7 + $0x8] sm:$0xff] }
  0x32   :  { %168 = vmatmul.mubr.f32.vlgmr.msra.gmra.mrb[0].mxu0 %v39_v63  ;;  %1129 = vmatprep.subr.bf16.mxu0 %v1435_v44  ;;  %v214_v44 = vld [vmem:[%s1983_s3 + $0x140] sm:$0xff]  ;;  %v436_v63 = vld [vmem:[%s1985_s7 + $0x90] sm:$0xff] }
  0x33   :  { %1131 = vmatpush1.bf16.msra.mxu0 %v1437_v45  ;;  %v219_v45 = vld [vmem:[%s1983_s3 + $0x168] sm:$0xff]  ;;  %v1106_v17 = vpack.c.bf16 %v216_v16, %v214_v44 }
  0x34   :  { %1133 = vmatprep.subr.bf16.mxu0 %v1448_v49  ;;  %v221_v49 = vld [vmem:[%s1983_s3 + $0x178] sm:$0xff]  ;;  %1103 = vmatpush1.bf16.msra.mxu1 %v1102_v14 }
  0x35   :  { %1105 = vmatprep.subr.bf16.mxu1 %v1104_v15  ;;  %v1108_v19 = vpack.c.bf16 %v221_v49, %v219_v45 }
  0x37   :  { %1135 = vmatpush1.bf16.msra.mxu0 %v1470_v58  ;;  %v225_v58 = vld [vmem:[%s1983_s3 + $0x198] sm:$0xff] }
  0x38   :  { %1137 = vmatprep.subr.bf16.mxu0 %v1476_v60  ;;  %1107 = vmatpush1.bf16.msra.mxu1 %v1106_v17  ;;  %v1110_v60 = vpack.c.bf16 %v220_v22, %v218_v21  ;;  %v1112_v24 = vpack.c.bf16 %v225_v58, %v223_v23  ;;  %v424_v22 = vld [vmem:[%s1985_s7 + $0x30] sm:$0xff]  ;;  %v425_v23 = vld [vmem:[%s1985_s7 + $0x38] sm:$0xff] }
  0x39   :  { %1109 = vmatprep.subr.bf16.mxu1 %v1108_v19  ;;  %v1206_v58 = vpack.c.bf16 %v425_v23, %v424_v22  ;;  %v691_v23 = vld [vmem:[%s1986_s9 + $0x50] sm:$0xff] }
  0x3b   :  { %1139 = vmatpush1.bf16.msra.mxu0 %v1500_v6  ;;  %v229_v6 = vld [vmem:[%s1983_s3 + $0x1b8] sm:$0xff] }
  0x3c   :  { %1141 = vmatprep.subr.bf16.mxu0 %v1506_v8  ;;  %1111 = vmatpush1.bf16.msra.mxu1 %v1110_v60  ;;  %v1114_v8 = vpack.c.bf16 %v224_v26, %v222_v25  ;;  %v1116_v28 = vpack.c.bf16 %v229_v6, %v227_v27  ;;  %v426_v26 = vld [vmem:[%s1985_s7 + $0x40] sm:$0xff]  ;;  %v427_v27 = vld [vmem:[%s1985_s7 + $0x48] sm:$0xff]  ;;  %v444_v6 = vld [vmem:[%s1985_s7 + $0xd0] sm:$0xff] }
  0x3d   :  { %1113 = vmatprep.subr.bf16.mxu1 %v1112_v24 }
  0x3f   :  { %1143 = vmatpush1.bf16.msra.mxu0 %v1530_v18  ;;  %v233_v18 = vld [vmem:[%s1983_s3 + $0x1d8] sm:$0xff] }
  0x40   :  { %1145 = vmatprep.subr.bf16.mxu0 %v1536_v20  ;;  %1115 = vmatpush1.bf16.msra.mxu1 %v1114_v8  ;;  %v1118_v20 = vpack.c.bf16 %v228_v31, %v226_v29  ;;  %v1120_v34 = vpack.c.bf16 %v233_v18, %v231_v33  ;;  %v428_v29 = vld [vmem:[%s1985_s7 + $0x50] sm:$0xff]  ;;  %v429_v31 = vld [vmem:[%s1985_s7 + $0x58] sm:$0xff]  ;;  %v446_v18 = vld [vmem:[%s1985_s7 + $0xe0] sm:$0xff] }
  0x41   :  { %1117 = vmatprep.subr.bf16.mxu1 %v1116_v28 }
  0x43   :  { %1147 = vmatpush1.bf16.msra.mxu0 %v1560_v30  ;;  %v1122_v30 = vpack.c.bf16 %v232_v36, %v230_v35  ;;  %v430_v36 = vld [vmem:[%s1985_s7 + $0x60] sm:$0xff] }
  0x44   :  { %1149 = vmatprep.subr.bf16.mxu0 %v1566_v32  ;;  %1119 = vmatpush1.bf16.msra.mxu1 %v1118_v20  ;;  %v235_v32 = vld [vmem:[%s1983_s3 + $0x1e8] sm:$0xff] }
  0x45   :  { %1121 = vmatprep.subr.bf16.mxu1 %v1120_v34  ;;  %v1124_v38 = vpack.c.bf16 %v237_v37, %v235_v32  ;;  %v448_v32 = vld [vmem:[%s1985_s7 + $0xf0] sm:$0xff]  ;;  %v449_v37 = vld [vmem:[%s1985_s7 + $0xf8] sm:$0xff] }
  0x47   :  { %1151 = vmatpush1.bf16.msra.mxu0 %v1587_v41  ;;  %v1126_v41 = vpack.c.bf16 %v236_v40, %v234_v39  ;;  %v1220_v39 = vpack.c.bf16 %v449_v37, %v448_v32  ;;  %v432_v40 = vld [vmem:[%s1985_s7 + $0x70] sm:$0xff] }
  0x48   :  { %1153 = vmatprep.subr.bf16.mxu0 %v1590_v42  ;;  %1123 = vmatpush1.bf16.msra.mxu1 %v1122_v30  ;;  %v89_v42 = vlaneseq }
  0x49   :  { %1125 = vmatprep.subr.bf16.mxu1 %v1124_v38 }
  0x4a   :  { %v90_v43 = vshrl.u32 %v89_v42, 7 }
  0x4b   :  { %1155 = vmatpush1.bf16.msra.mxu0 %v1611_v53 }
  0x4c   :  { %1157 = vmatprep.subr.bf16.mxu0 %v1617_v55  ;;  %1127 = vmatpush1.bf16.msra.mxu1 %v1126_v41  ;;  %v1757_v46 = vsub.s32 1, %v90_v43  ;;  %v1762_v48 = vsub.s32 0, %v90_v43  ;;  %v1281_v43 = vmov 0.0  }
  0x4d   :  { %1193 = vmatprep.subr.bf16.mxu1 %v1192_v61  ;;  %v687_v61 = vld [vmem:[%s1986_s9 + $0x30] sm:$0xff] }
  0x4e   :  { %v96_v50 = vrot.slane %v87_v47, %v1757_v46  ;;  %v92_v51 = vrot.slane %v87_v47, %v1762_v48  ;;  %v681_v47 = vld [vmem:[%s1986_s9] sm:$0xff] }
  0x4f   :  { %1159 = vmatpush1.bf16.msra.mxu0 %v1635_v0  ;;  %v437_v0 = vld [vmem:[%s1985_s7 + $0x98] sm:$0xff] }
  0x50   :  { %1161 = vmatprep.subr.bf16.mxu0 %v1638_v1  ;;  %v1194_v1 = vpack.c.bf16 %v419_v62, %v418_v59  ;;  %v1196_v2 = vpack.c.bf16 %v437_v0, %v436_v63  ;;  %v1231_v59 = vpack.c.bf16 %v686_v57, %v685_v56  ;;  %v688_v62 = vld [vmem:[%s1986_s9 + $0x38] sm:$0xff] }
  0x51   :  { %v1234_v63 = vpack.c.bf16 %v688_v62, %v687_v61 }
  0x53   :  { %1163 = vmatpush1.bf16.msra.mxu0 %v1653_v7  ;;  %v439_v7 = vld [vmem:[%s1985_s7 + $0xa8] sm:$0xff] }
  0x54   :  { %1165 = vmatprep.subr.bf16.mxu0 %v1656_v9  ;;  %v1198_v9 = vpack.c.bf16 %v421_v4, %v420_v3  ;;  %v1200_v10 = vpack.c.bf16 %v439_v7, %v438_v5  ;;  %v859_v4 = vld [vmem:[%s1984_s4 + $0x1] ss:$4 sm:$0x3]  ;;  %v860_v7 = vld [vmem:[%s1984_s4 + $0x2] ss:$4 sm:$0x3] }
  0x55   :  { %v394_v5 = vrot.slane %v859_v4, %v1762_v48 }
  0x57   :  { %1167 = vmatpush1.bf16.msra.mxu0 %v1102_v14 }
  0x58   :  { %1169 = vmatprep.subr.bf16.mxu0 %v1104_v15 }
  0x5b   :  { %1171 = vmatpush1.bf16.msra.mxu0 %v1106_v17  ;;  %v440_v17 = vld [vmem:[%s1985_s7 + $0xb0] sm:$0xff] }
  0x5c   :  { %1173 = vmatprep.subr.bf16.mxu0 %v1108_v19  ;;  %v441_v19 = vld [vmem:[%s1985_s7 + $0xb8] sm:$0xff] }
  0x5d   :  { %v1204_v21 = vpack.c.bf16 %v441_v19, %v440_v17 }
  0x5f   :  { %1175 = vmatpush1.bf16.msra.mxu0 %v1110_v60  ;;  %v442_v60 = vld [vmem:[%s1985_s7 + $0xc0] sm:$0xff] }
  0x60   :  { %1177 = vmatprep.subr.bf16.mxu0 %v1112_v24  ;;  %v443_v24 = vld [vmem:[%s1985_s7 + $0xc8] sm:$0xff] }
  0x61   :  { %v1208_v25 = vpack.c.bf16 %v443_v24, %v442_v60  ;;  %v693_v24 = vld [vmem:[%s1986_s9 + $0x60] sm:$0xff] }
  0x63   :  { %1179 = vmatpush1.bf16.msra.mxu0 %v1114_v8  ;;  %v1210_v8 = vpack.c.bf16 %v427_v27, %v426_v26  ;;  %v695_v27 = vld [vmem:[%s1986_s9 + $0x70] sm:$0xff] }
  0x64   :  { %1181 = vmatprep.subr.bf16.mxu0 %v1116_v28  ;;  %v445_v28 = vld [vmem:[%s1985_s7 + $0xd8] sm:$0xff] }
  0x65   :  { %v1212_v33 = vpack.c.bf16 %v445_v28, %v444_v6  ;;  %v696_v6 = vld [vmem:[%s1986_s9 + $0x78] sm:$0xff] }
  0x67   :  { %1183 = vmatpush1.bf16.msra.mxu0 %v1118_v20  ;;  %v447_v20 = vld [vmem:[%s1985_s7 + $0xe8] sm:$0xff] }
  0x68   :  { %1185 = vmatprep.subr.bf16.mxu0 %v1120_v34  ;;  %v1214_v34 = vpack.c.bf16 %v429_v31, %v428_v29  ;;  %v1216_v35 = vpack.c.bf16 %v447_v20, %v446_v18 }
  0x6b   :  { %1187 = vmatpush1.bf16.msra.mxu0 %v1122_v30  ;;  %v431_v30 = vld [vmem:[%s1985_s7 + $0x68] sm:$0xff] }
  0x6c   :  { %1189 = vmatprep.subr.bf16.mxu0 %v1124_v38  ;;  %v1218_v38 = vpack.c.bf16 %v431_v30, %v430_v36  ;;  %v864_v36 = vld [vmem:[%s1989_s8] ss:$0 sm:$0xff] }
  0x6f   :  { %1191 = vmatpush1.bf16.msra.mxu0 %v1126_v41  ;;  %v433_v41 = vld [vmem:[%s1985_s7 + $0x78] sm:$0xff] }
  0x70   :  { %v1222_v42 = vpack.c.bf16 %v433_v41, %v432_v40 }
 0x105   :  { %v169_v52 = vpop.f32.mrb[0].mxu0 }
 0x106   :  { %v171_v53 = vpop.f32.mrb[1].mxu0  ;;  %v170_v55 = vadd.f32 %v169_v52, %v92_v51  ;;  %v1283_v51 = vmov 0.0|0.0  }
 0x107   :  { %v172_v54 = vadd.f32 %v171_v53, %v96_v50  ;;  %v682_v50 = vld [vmem:[%s1986_s9 + $0x8] sm:$0xff]  ;;  %1248 = vmatprep.subr.bf16.mxu0 %v1283_v51  ;;  %v683_v53 = vld [vmem:[%s1986_s9 + $0x10] sm:$0xff] }
 0x108   :  { %v1225_v52 = vpack.c.bf16 %v682_v50, %v681_v47 }
 0x109   :  { %302 = vmatprep.mubr.f32.mxu1 %v172_v54 }
 0x10a   :  { %303 = vmatmul.mubr.f32.vlgmr.msra.gmra.mrb[0].mxu1 %v170_v55 }
 0x10b   :  { %1195 = vmatpush3.bf16.msra.mxu1 %v1194_v1 }
 0x10c   :  { %1197 = vmatprep.subr.bf16.mxu1 %v1196_v2 }
 0x10f   :  { %1199 = vmatpush3.bf16.msra.mxu1 %v1198_v9 }
 0x110   :  { %1201 = vmatprep.subr.bf16.mxu1 %v1200_v10  ;;  %v398_v10 = vrot.slane %v859_v4, %v1757_v46 }
 0x113   :  { %1203 = vmatpush3.bf16.msra.mxu1 %v1202_v13 }
 0x114   :  { %1205 = vmatprep.subr.bf16.mxu1 %v1204_v21  ;;  %v521_v21 = vld [vmem:[%s1987_s6] sm:$0xff] }
 0x117   :  { %1207 = vmatpush3.bf16.msra.mxu1 %v1206_v58  ;;  %v692_v58 = vld [vmem:[%s1986_s9 + $0x58] sm:$0xff] }
 0x118   :  { %1209 = vmatprep.subr.bf16.mxu1 %v1208_v25  ;;  %v1240_v60 = vpack.c.bf16 %v692_v58, %v691_v23  ;;  %v694_v25 = vld [vmem:[%s1986_s9 + $0x68] sm:$0xff] }
 0x119   :  { %v1243_v26 = vpack.c.bf16 %v694_v25, %v693_v24 }
 0x11b   :  { %1211 = vmatpush3.bf16.msra.mxu1 %v1210_v8  ;;  %v1246_v8 = vpack.c.bf16 %v696_v6, %v695_v27 }
 0x11c   :  { %1213 = vmatprep.subr.bf16.mxu1 %v1212_v33 }
 0x11f   :  { %1215 = vmatpush3.bf16.msra.mxu1 %v1214_v34  ;;  %v863_v34 = vld [vmem:[%s1989_s8 + $0x3] ss:$0 sm:$0xff] }
 0x120   :  { %1217 = vmatprep.subr.bf16.mxu1 %v1216_v35 }
 0x123   :  { %1219 = vmatpush3.bf16.msra.mxu1 %v1218_v38 }
 0x124   :  { %1221 = vmatprep.subr.bf16.mxu1 %v1220_v39 }
 0x127   :  { %1223 = vmatpush3.bf16.msra.mxu1 %v1222_v42 }
 0x128   :  { %940 = vmatprep.subr.mxu1 %v1281_v43 }
 0x1dd   :  { %v304_v14 = vpop.f32.mrb[0].mxu1 }
 0x1de   :  { %v1802_v15 = vsub.f32 %v170_v55, %v304_v14  ;;  %v306_v44 = vpop.f32.mrb[1].mxu1  ;;  %v413_v14 = vrot.slane %v860_v7, %v1757_v46  ;;  %v520_v46 = vld [vmem:[%s1988_s5] sm:$0xff] }
 0x1df   :  { %v1804_v16 = vsub.f32 %v172_v54, %v306_v44  ;;  %v684_v54 = vld [vmem:[%s1986_s9 + $0x18] sm:$0xff]  ;;  %v409_v44 = vrot.slane %v860_v7, %v1762_v48  ;;  %v596_v48 = vld [vmem:[%s1987_s6 + $0x8] sm:$0xff] }
 0x1e0   :  { %v311_v49 = vmul.f32 %v1802_v15, %v1802_v15  ;;  %v1228_v55 = vpack.c.bf16 %v684_v54, %v683_v53  ;;  %v866_v54 = vld [vmem:[%s1989_s8 + $0x2] ss:$0 sm:$0xff] }
 0x1e1   :  { %v312_v45 = vmul.f32 %v1804_v16, %v1804_v16 }
 0x1e3   :  { %377 = vmatprep.mubr.f32.mxu0 %v312_v45 }
 0x1e4   :  { %378 = vmatmul.mubr.f32.vlgmr.msra.gmra.mrb[2].mxu0 %v311_v49 }
 0x1e5   :  { %1017 = vmatprep.mubr.msk.f32.mxu0 %vm1282_vm1, %v1281_v43  ;;  %1250 = vmatpush3.bf16.msra.mxu0 %v1225_v52 }
 0x1e6   :  { %1251 = vmatprep.subr.bf16.mxu0 %v1283_v51 }
 0x1e9   :  { %1253 = vmatpush3.bf16.msra.mxu0 %v1228_v55 }
 0x1ea   :  { %1254 = vmatprep.subr.bf16.mxu0 %v1283_v51 }
 0x1ed   :  { %1256 = vmatpush3.bf16.msra.mxu0 %v1231_v59 }
 0x1ee   :  { %1257 = vmatprep.subr.bf16.mxu0 %v1283_v51 }
 0x1f1   :  { %1259 = vmatpush3.bf16.msra.mxu0 %v1234_v63 }
 0x1f2   :  { %1260 = vmatprep.subr.bf16.mxu0 %v1283_v51 }
 0x2b7   :  { %v379_v0 = vpop.f32.mrb[2].mxu0 }
 0x2b8   :  { %v380_v1 = vadd.f32 1e-05, %v379_v0  ;;  %v381_v2 = vpop.f32.mrb[3].mxu0 }
 0x2b9   :  { %v382_v3 = vadd.f32 1e-05, %v381_v2 }
 0x2ba   :  { %1275 = vrsqrt.f32 %v380_v1 }
 0x2bb   :  { %1277 = vrsqrt.f32 %v382_v3 }
 0x2c4   :  { %v1276_v9 = vpop.eup %1275 }
 0x2c5   :  { %v1278_v11 = vpop.eup %1277  ;;  %v386_v12 = vmul.f32 %v1276_v9, %v1802_v15  ;;  %v689_v15 = vld [vmem:[%s1986_s9 + $0x40] sm:$0xff] }
 0x2c6   :  { %v387_v13 = vmul.f32 %v1278_v11, %v1804_v16  ;;  %v690_v16 = vld [vmem:[%s1986_s9 + $0x48] sm:$0xff] }
 0x2c7   :  { %v401_v45 = vmul.f32 %v394_v5, %v386_v12  ;;  %v1237_v22 = vpack.c.bf16 %v690_v16, %v689_v15 }
 0x2c8   :  { %v402_v49 = vmul.f32 %v398_v10, %v387_v13 }
 0x2c9   :  { %v416_v19 = vadd.f32 %v409_v44, %v401_v45  ;;  %1262 = vmatpush3.bf16.msra.mxu0 %v1237_v22 }
 0x2ca   :  { %v417_v17 = vadd.f32 %v413_v14, %v402_v49  ;;  %1263 = vmatprep.subr.bf16.mxu0 %v1283_v51 }
 0x2cc   :  { %514 = vmatprep.mubr.f32.mxu1 %v417_v17 }
 0x2cd   :  { %515 = vmatmul.mubr.f32.vlgmr.msra.gmra.mrb[2].mxu1 %v416_v19  ;;  %1265 = vmatpush3.bf16.msra.mxu0 %v1240_v60 }
 0x2ce   :  { %941 = vmatpush3.msra.mxu1 %v521_v21  ;;  %942 = vmatprep.mubr.msk.f32.mxu1 %vm1282_vm1, %v1281_v43 }
 0x2cf   :  { %945 = vmatprep.subr.mxu1 %v1281_v43  ;;  %1266 = vmatprep.subr.bf16.mxu0 %v1283_v51 }
 0x2d1   :  { %943 = vmatmul.mubr.msk.f32.vlgmr.msra.gmra.mrb[4].mxu1 %vm522_vm2, %v520_v46  ;;  %1268 = vmatpush3.bf16.msra.mxu0 %v1243_v26 }
 0x2d2   :  { %946 = vmatpush3.msra.mxu1 %v596_v48  ;;  %947 = vmatprep.mubr.msk.f32.mxu1 %vm1282_vm1, %v1281_v43 }
 0x2d3   :  { %1224 = vmatprep.subr.bf16.mxu1 %v1283_v51  ;;  %1269 = vmatprep.subr.bf16.mxu0 %v1283_v51 }
 0x2d5   :  { %948 = vmatmul.mubr.msk.f32.vlgmr.msra.gmra.mrb[6].mxu1 %vm522_vm2, %v520_v46  ;;  %1271 = vmatpush3.bf16.msra.mxu0 %v1246_v8 }
 0x2d6   :  { %1226 = vmatpush3.bf16.msra.mxu1 %v1225_v52  ;;  %982 = vmatprep.mubr.msk.f32.mxu1 %vm1282_vm1, %v1281_v43  ;;  %v865_v52 = vld [vmem:[%s1989_s8 + $0x1] ss:$0 sm:$0xff] }
 0x2d7   :  { %1227 = vmatprep.subr.bf16.mxu1 %v1283_v51 }
 0x2da   :  { %1229 = vmatpush3.bf16.msra.mxu1 %v1228_v55 }
 0x2db   :  { %1230 = vmatprep.subr.bf16.mxu1 %v1283_v51 }
 0x2de   :  { %1232 = vmatpush3.bf16.msra.mxu1 %v1231_v59 }
 0x2df   :  { %1233 = vmatprep.subr.bf16.mxu1 %v1283_v51 }
 0x2e2   :  { %1235 = vmatpush3.bf16.msra.mxu1 %v1234_v63 }
 0x2e3   :  { %1236 = vmatprep.subr.bf16.mxu1 %v1283_v51 }
 0x2e6   :  { %1238 = vmatpush3.bf16.msra.mxu1 %v1237_v22 }
 0x2e7   :  { %1239 = vmatprep.subr.bf16.mxu1 %v1283_v51 }
 0x2ea   :  { %1241 = vmatpush3.bf16.msra.mxu1 %v1240_v60 }
 0x2eb   :  { %1242 = vmatprep.subr.bf16.mxu1 %v1283_v51 }
 0x2ee   :  { %1244 = vmatpush3.bf16.msra.mxu1 %v1243_v26 }
 0x2ef   :  { %1245 = vmatprep.subr.bf16.mxu1 %v1283_v51 }
 0x2f2   :  { %1247 = vmatpush3.bf16.msra.mxu1 %v1246_v8 }
 0x3a0   :  { %v899_v28 = vpop.f32.mrb[2].mxu1 }
 0x3a1   :  { %v900_v29 = vpop.f32.mrb[3].mxu1 }
 0x3a2   :  { %v901_v31 = vadd.f32 %v900_v29, %v899_v28 }
 0x3a4   :  { %v592_v33 = vpop.f32.mrb[4].mxu1 }
 0x3a5   :  { %v667_v18 = vmul.f32 %v901_v31, %v592_v33  ;;  %v944_v20 = vpop.f32.mrb[5].mxu1 }
 0x3a8   :  { %v663_v35 = vpop.f32.mrb[6].mxu1 }
 0x3a9   :  { %v673_v30 = vmul.f32 %v863_v34, %v663_v35  ;;  %v949_v32 = vpop.f32.mrb[7].mxu1 }
 0x3ab   :  { %v679_v37 = vadd.f32 %v864_v36, %v673_v30 }
 0x3ad   :  { %v680_v38 = vadd.f32 %v679_v37, %v667_v18 }
 0x3af   :  { %983 = vmatmul.mubr.f32.vlgmr.msra.gmra.mrb[8].mxu1 %v680_v38 }
 0x482   :  { %v763_v39 = vpop.f32.mrb[8].mxu1 }
 0x483   :  { %v767_v40 = vsub.f32 %v680_v38, %v763_v39  ;;  %v984_v41 = vpop.f32.mrb[9].mxu1 }
 0x485   :  { %v768_v42 = vmul.f32 %v767_v40, %v767_v40 }
 0x487   :  { %1018 = vmatmul.mubr.f32.vlgmr.msra.gmra.mrb[4].mxu0 %v768_v42 }
 0x55a   :  { %v835_v43 = vpop.f32.mrb[4].mxu0 }
 0x55b   :  { %v836_v47 = vadd.f32 1e-05, %v835_v43  ;;  %v1019_v50 = vpop.f32.mrb[5].mxu0 }
 0x55d   :  { %1279 = vrsqrt.f32 %v836_v47 }
 0x567   :  { %v1280_v51 = vpop.eup %1279 }
 0x568   :  { %v840_v53 = vmul.f32 %v1280_v51, %v767_v40 }
 0x56a   :  { %v846_v55 = vmul.f32 %v865_v52, %v840_v53 }
 0x56c   :  { %v852_v56 = vadd.f32 %v866_v54, %v846_v55 }
 0x56e   :  { %853 = vst [vmem:[%s1990_s10] sm:$0xff] %v852_v56 }

</bundles_post_ra>
